<compile_context>
chip_gen: v7x
topology: tpu7x:2x2x1
jax: 0.10.0
libtpu: 0.0.40
codegen_flags: <defaults>
</compile_context>

<pallas_src>
import functools
from typing import NamedTuple

import jax
import jax.numpy as jnp
from jax.experimental import pallas as pl
from jax.experimental.pallas import tpu as pltpu

_LANE = 128        # lane width of a vreg
_SUBLANE = 8       # sublane count of a vreg
_VPU_F_MAX = 8     # below/at this K, skip the MXU for the first layer
_VPU_O_MAX = 8     # below/at this O, skip the MXU for the second layer (unpadded out)
_SMALL_WORK = 100_000  # below this many hidden elements, plain XLA fusion wins


def _round_up(n, m):
    return ((n + m - 1) // m) * m


class NetParams(NamedTuple):
    w1: jax.Array          # (F, H_pad)
    b1: jax.Array          # (1, H_pad)
    w2: jax.Array          # MXU path: (H_pad, O_pad); VPU path: (O, H_pad) (pre-transposed)
    b2: jax.Array          # MXU path: (1, O_pad);     VPU path: (1, O)
    n_features: int
    n_hidden: int
    n_output: int
    vpu_first_layer: bool
    vpu_second_layer: bool


def prepare_params(w1, b1, w2, b2):
    """Pad / lay out the Linear weights ONCE (hoisted out of the per-call path).

    w1: [F, H]; b1: [H] or [1, H]; w2: [H, O]; b2: [O] or [1, O]
    (PyTorch nn.Linear stores [out, in]; here weights are pre-transposed.)
    """
    f, h = w1.shape
    o = w2.shape[1]
    b1 = b1.reshape(1, h)
    b2 = b2.reshape(1, o)

    h_pad = _round_up(h, _LANE)
    vpu_first = f <= _VPU_F_MAX
    vpu_second = o <= _VPU_O_MAX

    # Padded hidden lanes: w1 cols / b1 tail are zero -> hidden stays 0 thru ReLU.
    w1p = jnp.zeros((f, h_pad), w1.dtype).at[:, :h].set(w1)
    b1p = jnp.zeros((1, h_pad), b1.dtype).at[:, :h].set(b1)

    if vpu_second:
        # Layer 2 on the VPU: pre-transpose W2 -> (O, H_pad) so each row is
        # lane-dense in-kernel (no in-kernel transpose).  Output stays UNPADDED.
        w2p = jnp.zeros((o, h_pad), w2.dtype).at[:, :h].set(w2.T)
        b2p = b2
    else:
        o_pad = _round_up(o, _LANE)
        w2p = jnp.zeros((h_pad, o_pad), w2.dtype).at[:h, :o].set(w2)
        b2p = jnp.zeros((1, o_pad), b2.dtype).at[:, :o].set(b2)

    return NetParams(w1p, b1p, w2p, b2p, f, h, o, vpu_first, vpu_second)


def mlp_kernel(x_ref, w1_ref, b1_ref, w2_ref, b2_ref, o_ref, *,
               vpu_first_layer, vpu_second_layer):
    x = x_ref[...]                                   # (tm, F) f32
    tm = x.shape[0]
    h_pad = w1_ref.shape[1]

    if vpu_first_layer:
        # K (= n_features) is tiny: MXU fill/drain would dominate; do layer 1 as
        # VPU broadcast multiply-adds with the bias folded into the init.
        h = jnp.broadcast_to(b1_ref[...], (tm, h_pad))
        for fi in range(x.shape[1]):                 # static, tiny (F == 2)
            h = h + x[:, fi:fi + 1] * w1_ref[fi:fi + 1, :]
    else:
        h = jnp.dot(x, w1_ref[...], preferred_element_type=jnp.float32) + b1_ref[...]

    h = jnp.maximum(h, 0.0)                          # ReLU (VPU, f32)

    if vpu_second_layer:
        # O is tiny: per-column VPU multiply + lane (XLU) reduce against the
        # pre-transposed (O, H_pad) W2; output block stays unpadded (tm, O).
        n_out = w2_ref.shape[0]
        cols = [jnp.sum(h * w2_ref[j:j + 1, :], axis=-1, keepdims=True)
                for j in range(n_out)]               # static, tiny (O == 2)
        o = jnp.concatenate(cols, axis=-1) + b2_ref[...]
    else:
        # Large O: MXU with f32 accumulation, lane-dense output.
        o = jnp.dot(h, w2_ref[...], preferred_element_type=jnp.float32) + b2_ref[...]

    o_ref[...] = o.astype(o_ref.dtype)


def net_forward(x, params: NetParams, *, block_rows=2048, use_pallas=None):
    """Net.forward: relu(x @ w1 + b1) @ w2 + b2, with pre-prepared params."""
    n, f = x.shape
    assert f == params.n_features
    o_out = params.n_output
    h_pad = params.w1.shape[1]

    if use_pallas is None:
        use_pallas = n * h_pad >= _SMALL_WORK
    if not use_pallas:
        # Tiny-batch fast path: pallas_call launch overhead dominates.
        h_full = jnp.maximum(x @ params.w1 + params.b1, 0.0)
        if params.vpu_second_layer:
            return h_full @ params.w2.T + params.b2
        return (h_full @ params.w2 + params.b2)[:, :o_out]

    # Pad the batch only to a sublane multiple (<= 7 extra rows), not a full
    # tile; the grid's last block may be partial (Pallas masks the boundary).
    n8 = _round_up(max(n, 1), _SUBLANE)
    xp = x if n8 == n else jnp.zeros((n8, f), x.dtype).at[:n, :].set(x)

    tm = min(block_rows, n8)
    grid = (pl.cdiv(n8, tm),)

    out_cols = o_out if params.vpu_second_layer else params.w2.shape[1]

    kernel = functools.partial(
        mlp_kernel,
        vpu_first_layer=params.vpu_first_layer,
        vpu_second_layer=params.vpu_second_layer,
    )
    vmem_spec = functools.partial(pl.BlockSpec, memory_space=pltpu.MemorySpace.VMEM)

    out = pl.pallas_call(
        kernel,
        out_shape=jax.ShapeDtypeStruct((n8, out_cols), x.dtype),
        grid=grid,
        in_specs=[
            vmem_spec((tm, f), lambda i: (i, 0)),           # x tile, pipelined over N
            vmem_spec(params.w1.shape, lambda i: (0, 0)),   # W1 resident in VMEM
            vmem_spec(params.b1.shape, lambda i: (0, 0)),   # b1 resident
            vmem_spec(params.w2.shape, lambda i: (0, 0)),   # W2 resident
            vmem_spec(params.b2.shape, lambda i: (0, 0)),   # b2 resident
        ],
        out_specs=vmem_spec((tm, out_cols), lambda i: (i, 0)),
        compiler_params=pltpu.CompilerParams(
            # Batch tiles are independent -> shard across TCs on v7x megacore.
            dimension_semantics=("parallel",),
        ),
    )(xp, params.w1, params.b1, params.w2, params.b2)

    return out[:n, :o_out]


def init_params(key, n_features, n_hidden, n_output):
    # Deterministic init mimicking torch.nn.Linear (uniform +/- 1/sqrt(fan_in)).
    k1, k2, k3, k4 = jax.random.split(key, 4)
    lim1 = 1.0 / jnp.sqrt(jnp.float32(n_features))
    lim2 = 1.0 / jnp.sqrt(jnp.float32(n_hidden))
    w1 = jax.random.uniform(k1, (n_features, n_hidden), jnp.float32, -lim1, lim1)
    b1 = jax.random.uniform(k2, (1, n_hidden), jnp.float32, -lim1, lim1)
    w2 = jax.random.uniform(k3, (n_hidden, n_output), jnp.float32, -lim2, lim2)
    b2 = jax.random.uniform(k4, (1, n_output), jnp.float32, -lim2, lim2)
    return w1, b1, w2, b2


if __name__ == "__main__":
    key = jax.random.PRNGKey(0)
    kx, kp = jax.random.split(key)

    # Net(n_features=2, n_hidden=32, n_output=2) on two-Gaussian-cluster data.
    N, F, H, O = 8, 2, 32, 2
    x0 = 2.0 + jax.random.normal(kx, (N // 2, F), jnp.float32)
    x1 = -2.0 + jax.random.normal(jax.random.fold_in(kx, 1), (N // 2, F), jnp.float32)
    x = jnp.concatenate([x0, x1], axis=0)

    w1, b1, w2, b2 = init_params(kp, F, H, O)
    params = prepare_params(w1, b1, w2, b2)   # one-time padding / layout

    # Force the Pallas path (the auto heuristic would pick plain XLA at N=8).
    out = net_forward(x, params, use_pallas=True)
    out = jax.block_until_ready(out)

    # Reference check in plain JAX against the ORIGINAL unpadded parameters.
    ref = jnp.maximum(x @ w1 + b1, 0.0) @ w2 + b2
    assert out.shape == (N, O)
    assert jnp.allclose(out, ref, atol=1e-5, rtol=1e-5)

    print("KERNEL_OK")
</pallas_src>

<mosaic_0001>
module attributes {stable_mosaic.version = 11 : i64} {
  func.func @mlp_kernel(%arg0: i32, %arg1: memref<8x2xf32, #tpu.memory_space<vmem>>, %arg2: memref<2x128xf32, #tpu.memory_space<vmem>>, %arg3: memref<1x128xf32, #tpu.memory_space<vmem>>, %arg4: memref<2x128xf32, #tpu.memory_space<vmem>>, %arg5: memref<1x2xf32, #tpu.memory_space<vmem>>, %arg6: memref<8x2xf32, #tpu.memory_space<vmem>>) attributes {dimension_semantics = [#tpu.dimension_semantics<parallel>], iteration_bounds = array<i64: 1>, scalar_prefetch = 0 : i64, scratch_operands = 0 : i64, tpu.core_type = #tpu.core_type<tc>, window_params = [{transform_indices = @transform_0, window_bounds = array<i64: 8, 2>}, {pipeline_mode = #tpu.pipeline_mode<synchronous>, transform_indices = @transform_1, window_bounds = array<i64: 2, 128>}, {pipeline_mode = #tpu.pipeline_mode<synchronous>, transform_indices = @transform_2, window_bounds = array<i64: 1, 128>}, {pipeline_mode = #tpu.pipeline_mode<synchronous>, transform_indices = @transform_3, window_bounds = array<i64: 2, 128>}, {pipeline_mode = #tpu.pipeline_mode<synchronous>, transform_indices = @transform_4, window_bounds = array<i64: 1, 2>}, {transform_indices = @transform_5, window_bounds = array<i64: 8, 2>}]} {
    %c0 = arith.constant 0 : index
    %c0_0 = arith.constant 0 : index
    %0 = vector.load %arg1[%c0, %c0_0] : memref<8x2xf32, #tpu.memory_space<vmem>>, vector<8x2xf32>
    %c0_1 = arith.constant 0 : index
    %c0_2 = arith.constant 0 : index
    %1 = vector.load %arg3[%c0_1, %c0_2] : memref<1x128xf32, #tpu.memory_space<vmem>>, vector<1x128xf32>
    %2 = vector.shape_cast %1 : vector<1x128xf32> to vector<1x128xf32>
    %3 = vector.broadcast %2 : vector<1x128xf32> to vector<8x128xf32>
    %4 = vector.extract_strided_slice %0 {offsets = [0, 0], sizes = [8, 1], strides = [1, 1]} : vector<8x2xf32> to vector<8x1xf32>
    %c0_3 = arith.constant 0 : index
    %c0_4 = arith.constant 0 : index
    %5 = vector.load %arg2[%c0_3, %c0_4] : memref<2x128xf32, #tpu.memory_space<vmem>>, vector<1x128xf32>
    %6 = vector.broadcast %4 : vector<8x1xf32> to vector<8x128xf32>
    %7 = vector.broadcast %5 : vector<1x128xf32> to vector<8x128xf32>
    %8 = arith.mulf %6, %7 : vector<8x128xf32>
    %9 = arith.addf %3, %8 : vector<8x128xf32>
    %10 = vector.extract_strided_slice %0 {offsets = [0, 1], sizes = [8, 1], strides = [1, 1]} : vector<8x2xf32> to vector<8x1xf32>
    %c1 = arith.constant 1 : index
    %c0_5 = arith.constant 0 : index
    %11 = vector.load %arg2[%c1, %c0_5] : memref<2x128xf32, #tpu.memory_space<vmem>>, vector<1x128xf32>
    %12 = vector.broadcast %10 : vector<8x1xf32> to vector<8x128xf32>
    %13 = vector.broadcast %11 : vector<1x128xf32> to vector<8x128xf32>
    %14 = arith.mulf %12, %13 : vector<8x128xf32>
    %15 = arith.addf %9, %14 : vector<8x128xf32>
    %cst = arith.constant 0.000000e+00 : f32
    %16 = vector.broadcast %cst : f32 to vector<8x128xf32>
    %17 = arith.maximumf %15, %16 : vector<8x128xf32>
    %c0_6 = arith.constant 0 : index
    %c0_7 = arith.constant 0 : index
    %18 = vector.load %arg4[%c0_6, %c0_7] : memref<2x128xf32, #tpu.memory_space<vmem>>, vector<1x128xf32>
    %19 = vector.broadcast %18 : vector<1x128xf32> to vector<8x128xf32>
    %20 = arith.mulf %17, %19 : vector<8x128xf32>
    %cst_8 = arith.constant dense<0.000000e+00> : vector<8xf32>
    %21 = vector.multi_reduction <add>, %20, %cst_8 [1] : vector<8x128xf32> to vector<8xf32>
    %22 = vector.shape_cast %21 : vector<8xf32> to vector<8x1xf32>
    %c1_9 = arith.constant 1 : index
    %c0_10 = arith.constant 0 : index
    %23 = vector.load %arg4[%c1_9, %c0_10] : memref<2x128xf32, #tpu.memory_space<vmem>>, vector<1x128xf32>
    %24 = vector.broadcast %23 : vector<1x128xf32> to vector<8x128xf32>
    %25 = arith.mulf %17, %24 : vector<8x128xf32>
    %cst_11 = arith.constant dense<0.000000e+00> : vector<8xf32>
    %26 = vector.multi_reduction <add>, %25, %cst_11 [1] : vector<8x128xf32> to vector<8xf32>
    %27 = vector.shape_cast %26 : vector<8xf32> to vector<8x1xf32>
    %28 = tpu.concatenate %22, %27 in 1 : vector<8x1xf32>, vector<8x1xf32> -> vector<8x2xf32>
    %c0_12 = arith.constant 0 : index
    %c0_13 = arith.constant 0 : index
    %29 = vector.load %arg5[%c0_12, %c0_13] : memref<1x2xf32, #tpu.memory_space<vmem>>, vector<1x2xf32>
    %30 = vector.broadcast %29 : vector<1x2xf32> to vector<8x2xf32>
    %31 = arith.addf %28, %30 : vector<8x2xf32>
    %c0_14 = arith.constant 0 : index
    %c0_15 = arith.constant 0 : index
    %32 = vector.load %arg6[%c0_14, %c0_15] : memref<8x2xf32, #tpu.memory_space<vmem>>, vector<8x2xf32>
    tpu.vector_store %arg6[%c0_14, %c0_15], %31 {strides = array<i32>} : memref<8x2xf32, #tpu.memory_space<vmem>>, vector<8x2xf32>,
    return
  }
  func.func @transform_0(%arg0: i32) -> (i32, i32) {
    %c0_i32 = arith.constant 0 : i32
    %c0_i32_0 = arith.constant 0 : i32
    return %arg0, %c0_i32 : i32, i32
  }
  func.func @transform_1(%arg0: i32) -> (i32, i32) {
    %c0_i32 = arith.constant 0 : i32
    %c0_i32_0 = arith.constant 0 : i32
    %c0_i32_1 = arith.constant 0 : i32
    return %c0_i32, %c0_i32_0 : i32, i32
  }
  func.func @transform_2(%arg0: i32) -> (i32, i32) {
    %c0_i32 = arith.constant 0 : i32
    %c0_i32_0 = arith.constant 0 : i32
    %c0_i32_1 = arith.constant 0 : i32
    return %c0_i32, %c0_i32_0 : i32, i32
  }
  func.func @transform_3(%arg0: i32) -> (i32, i32) {
    %c0_i32 = arith.constant 0 : i32
    %c0_i32_0 = arith.constant 0 : i32
    %c0_i32_1 = arith.constant 0 : i32
    return %c0_i32, %c0_i32_0 : i32, i32
  }
  func.func @transform_4(%arg0: i32) -> (i32, i32) {
    %c0_i32 = arith.constant 0 : i32
    %c0_i32_0 = arith.constant 0 : i32
    %c0_i32_1 = arith.constant 0 : i32
    return %c0_i32, %c0_i32_0 : i32, i32
  }
  func.func @transform_5(%arg0: i32) -> (i32, i32) {
    %c0_i32 = arith.constant 0 : i32
    %c0_i32_0 = arith.constant 0 : i32
    return %arg0, %c0_i32 : i32, i32
  }
}

</mosaic_0001>

<bundles_post_ra>
// kernel: tpu_custom_call.1
= control target key start
LH: loop header
LB: loop body
LE: loop exit
PB: predicated region body
PF: predicated region fallthrough
CT: control target
= control target key end

     0   :  { %v94_v0 = vmov 0   ;;  %v95_v2 = vmov 1   ;;  %vm68_vm0 = vcmask 7168   ;;  %vm78_vm1 = vcmask 15360   ;;  %s150_s0 = inlined_call_operand.vmem [shape: f32[8,2], index: 0, kind: input, shape index: {}]   ;;  %s151_s1 = inlined_call_operand.vmem [shape: f32[2,128], index: 1, kind: input, shape index: {}]   ;;  %s152_s2 = inlined_call_operand.vmem [shape: f32[1,128], index: 2, kind: input, shape index: {}]   ;;  %s153_s3 = inlined_call_operand.vmem [shape: f32[2,128], index: 3, kind: input, shape index: {}]   ;;  %s154_s4 = inlined_call_operand.vmem [shape: f32[1,2], index: 4, kind: input, shape index: {}]   ;;  %s155_s5 = inlined_call_operand.vmem [shape: f32[8,2], index: 5, kind: output, shape index: {}]  }
   0x1   :  { %92 = vset.pattern.permute.xlu0 %v94_v0  ;;  %v20_v1 = vld [vmem:[%s150_s0] sm:$0xff] }
   0x2   :  { %31 = vperm.xlu0 %92, %v20_v1   ;;  %v85_v3 = vld [vmem:[%s151_s1] ss:$0 sm:$0xff]  ;;  %v86_v7 = vld [vmem:[%s151_s1 + $0x1] ss:$0 sm:$0xff] }
   0x3   :  { %v84_v6 = vld [vmem:[%s152_s2] ss:$0 sm:$0xff]  ;;  %v88_v15 = vld [vmem:[%s153_s3 + $0x1] ss:$0 sm:$0xff] }
   0x4   :  { %v87_v12 = vld [vmem:[%s153_s3] ss:$0 sm:$0xff] }
   0x5   :  { %v89_v18 = vld [vmem:[%s154_s4] ss:$0 sm:$0xff] }
   0x6   :  { %93 = vset.pattern.permute.xlu0 %v95_v2 }
   0x7   :  { %42 = vperm.xlu0 %93, %v20_v1  }
  0x81   :  { %v32_v4 = vpop.permute.xlu0 %31 }
  0x82   :  { %v38_v5 = vmul.f32 %v85_v3, %v32_v4 }
  0x84   :  { %v39_v9 = vadd.f32 %v84_v6, %v38_v5 }
  0x86   :  { %v43_v8 = vpop.permute.xlu0 %42 }
  0x87   :  { %v49_v10 = vmul.f32 %v86_v7, %v43_v8 }
  0x89   :  { %v50_v11 = vadd.f32 %v49_v10, %v39_v9 }
  0x8b   :  { %v51_v13 = vmax.f32 %v50_v11, 0.0 }
  0x8d   :  { %v57_v14 = vmul.f32 %v87_v12, %v51_v13  ;;  %v65_v16 = vmul.f32 %v88_v15, %v51_v13 }
  0x8f   :  { %58 = vadd.xlane.f32.xlu1 %v57_v14 }
  0x93   :  { %66 = vadd.xlane.f32.xlu1 %v65_v16 }
 0x11c   :  { %v59_v17 = vpop.xlane.xlu1 %58 }
 0x120   :  { %v67_v19 = vpop.xlane.xlu1 %66 }
 0x121   :  { %v69_v20 = vsel %vm68_vm0, %v59_v17, %v67_v19 }
 0x122   :  { %v77_v21 = vadd.f32 %v89_v18, %v69_v20 }
 0x124   :  { %79 = vst.msk [vmem:[%s155_s5] sm:$0xff] %vm78_vm1, %v77_v21 }

</bundles_post_ra>
